<compile_context>
chip_gen: v7x
topology: tpu7x:2x2x1
jax: 0.10.0
libtpu: 0.0.40
codegen_flags: <defaults>
</compile_context>

<pallas_src>
import functools

import jax
import jax.numpy as jnp
import numpy as np
from jax.experimental import pallas as pl
from jax.experimental.pallas import tpu as pltpu


# ----------------------------- Pallas kernel ------------------------------- #

def _stack_taps(x, wp):
    """Build the tap-stacked 3x3-conv operand from a padded-flat image.

    x  : (Cp, Lp) value; [:, :L] holds the zero-padded image flattened row-major.
    wp : padded image width (W + 2).

    Returns (9*Cp, Lp); rows [t*Cp:(t+1)*Cp] hold x shifted by tap t = (dy, dx):
        out[t*Cp + c, p] = x[c, (p + (dy-1)*wp + (dx-1)) mod Lp]
    The circular wrap only affects pad-ring / tail output positions, which are
    never consumed downstream.
    """
    lp = x.shape[-1]
    taps = []
    for dy in range(3):
        for dx in range(3):
            off = (dy - 1) * wp + (dx - 1)
            taps.append(x if off == 0 else pltpu.roll(x, shift=(-off) % lp, axis=1))
    return jnp.concatenate(taps, axis=0)


def _basic_block_kernel(x_ref, w1_ref, b1_ref, w2_ref, b2_ref, mask_ref, o_ref,
                        *, wp, b_blk):
    """Fused BasicBlock forward for b_blk images (stride=1, downsample=None)."""
    w1 = w1_ref[...]                     # (Cp, 9*Cp)  compute dtype, BN1-scaled
    w2 = w2_ref[...]                     # (Cp, 9*Cp)  compute dtype, BN2-scaled
    b1 = b1_ref[...]                     # (Cp, 1)     f32
    b2 = b2_ref[...]                     # (Cp, 1)     f32
    mask = mask_ref[...]                 # (1, Lp)     f32: 1 at interior, 0 ring/tail

    for b in range(b_blk):               # short, statically unrolled
        x = x_ref[b]                     # (Cp, Lp) f32, padded-flat
        # conv1 (BN1 folded) + bias + ReLU; zero ring/tail so it is conv2's padding.
        t1 = _stack_taps(x, wp).astype(w1.dtype)
        y1 = jnp.dot(w1, t1, preferred_element_type=jnp.float32)
        y1 = jnp.maximum(y1 + b1, 0.0) * mask
        # conv2 (BN2 folded) + bias + residual + ReLU.
        t2 = _stack_taps(y1, wp).astype(w2.dtype)
        y2 = jnp.dot(w2, t2, preferred_element_type=jnp.float32)
        y2 = y2 + b2 + x                 # residual (padded channels stay zero)
        o_ref[b] = jnp.maximum(y2, 0.0).astype(o_ref.dtype)   # lane-dense store


# ------------------------------ JAX wrapper -------------------------------- #

def _fold_bn(gamma, beta, running_mean, running_var, eps=1e-5):
    scale = gamma / jnp.sqrt(running_var + eps)
    bias = beta - running_mean * scale
    return scale, bias


def _prep_weight(w_hwio, scale, cp, dtype):
    """(3,3,Cin,Cout) * scale -> (Cp, 9*Cp), tap-major columns, zero-padded channels."""
    c_in, c_out = w_hwio.shape[2], w_hwio.shape[3]
    w = jnp.transpose(w_hwio * scale, (3, 0, 1, 2))          # (Cout, 3, 3, Cin)
    w = jnp.pad(w, ((0, cp - c_out), (0, 0), (0, 0), (0, cp - c_in)))
    return w.reshape(cp, 9 * cp).astype(dtype)


def basic_block_forward(x_nchw, params, *, batch_block=8,
                        compute_dtype=jnp.bfloat16):
    """Pallas implementation of BasicBlock.forward (stride=1, downsample=None)."""
    w1, w2 = params["w1"], params["w2"]                      # HWIO (3, 3, Cin, Cout)
    s1, b1 = _fold_bn(*params["bn1"])
    s2, b2 = _fold_bn(*params["bn2"])

    N, Cin, H, W = x_nchw.shape
    Cout = w1.shape[-1]
    assert Cin == Cout, "stride=1 / downsample=None requires inplanes == planes"
    C = Cin
    Cp = ((C + 7) // 8) * 8                                  # sublane-aligned channels
    Hp, Wp = H + 2, W + 2
    L = Hp * Wp                                              # padded-flat length
    Lp = ((L + 127) // 128) * 128                            # lane-dense flat length

    # BN scale folded into weights (compute dtype); biases stay f32.
    w1m = _prep_weight(w1, s1, Cp, compute_dtype)
    w2m = _prep_weight(w2, s2, Cp, compute_dtype)
    b1c = jnp.pad(b1, (0, Cp - C)).reshape(Cp, 1).astype(jnp.float32)
    b2c = jnp.pad(b2, (0, Cp - C)).reshape(Cp, 1).astype(jnp.float32)

    # Zero-pad spatially (ring), pad channels to Cp, flatten row-major, pad lanes to Lp.
    xp = jnp.pad(x_nchw.astype(jnp.float32),
                 ((0, 0), (0, Cp - C), (1, 1), (1, 1))).reshape(N, Cp, L)
    xp = jnp.pad(xp, ((0, 0), (0, 0), (0, Lp - L)))

    mask = jnp.pad(jnp.ones((H, W), jnp.float32), ((1, 1), (1, 1))).reshape(1, L)
    mask = jnp.pad(mask, ((0, 0), (0, Lp - L)))

    # Several images per grid step (amortize weights + per-step overhead).
    b_blk = max(1, min(batch_block, N))
    while N % b_blk:
        b_blk -= 1

    kernel = functools.partial(_basic_block_kernel, wp=Wp, b_blk=b_blk)

    out_flat = pl.pallas_call(
        kernel,
        out_shape=jax.ShapeDtypeStruct((N, Cp, Lp), jnp.float32),
        grid_spec=pltpu.PrefetchScalarGridSpec(
            num_scalar_prefetch=0,
            grid=(N // b_blk,),
            in_specs=[
                pl.BlockSpec((b_blk, Cp, Lp), lambda n: (n, 0, 0)),   # x, padded-flat
                pl.BlockSpec((Cp, 9 * Cp), lambda n: (0, 0)),         # w1 (BN-folded)
                pl.BlockSpec((Cp, 1), lambda n: (0, 0)),              # bias1
                pl.BlockSpec((Cp, 9 * Cp), lambda n: (0, 0)),         # w2 (BN-folded)
                pl.BlockSpec((Cp, 1), lambda n: (0, 0)),              # bias2
                pl.BlockSpec((1, Lp), lambda n: (0, 0)),              # interior mask
            ],
            out_specs=pl.BlockSpec((b_blk, Cp, Lp), lambda n: (n, 0, 0)),
        ),
        compiler_params=pltpu.CompilerParams(dimension_semantics=("parallel",)),
    )(xp, w1m, b1c, w2m, b2c, mask)

    # Strip channel padding, lane tail and the pad ring; result is NCHW.
    return out_flat[:, :C, :L].reshape(N, C, Hp, Wp)[:, :, 1:Hp - 1, 1:Wp - 1]


# ------------------------- pure-JAX reference ------------------------------ #

def _ref_bn(y_nchw, gamma, beta, rm, rv, eps=1e-5):
    c = y_nchw.shape[1]
    shp = (1, c, 1, 1)
    return (y_nchw - rm.reshape(shp)) / jnp.sqrt(rv.reshape(shp) + eps) \
        * gamma.reshape(shp) + beta.reshape(shp)


def basic_block_reference(x_nchw, params):
    w1_oihw = jnp.transpose(params["w1"], (3, 2, 0, 1))   # HWIO -> OIHW
    w2_oihw = jnp.transpose(params["w2"], (3, 2, 0, 1))
    dn = jax.lax.conv_dimension_numbers(x_nchw.shape, w1_oihw.shape,
                                        ("NCHW", "OIHW", "NCHW"))
    out = jax.lax.conv_general_dilated(x_nchw, w1_oihw, (1, 1), ((1, 1), (1, 1)),
                                       dimension_numbers=dn)
    out = jnp.maximum(_ref_bn(out, *params["bn1"]), 0.0)
    out = jax.lax.conv_general_dilated(out, w2_oihw, (1, 1), ((1, 1), (1, 1)),
                                       dimension_numbers=dn)
    out = _ref_bn(out, *params["bn2"])
    return jnp.maximum(out + x_nchw, 0.0)


# --------------------------------- main ------------------------------------ #

if __name__ == "__main__":
    N, C, H, W = 2, 4, 16, 16        # inplanes = planes = 4, stride = 1
    key = jax.random.PRNGKey(0)
    kx, kw1, kw2, kb1, kb2, km1, km2, kv1, kv2 = jax.random.split(key, 9)

    x = jax.random.normal(kx, (N, C, H, W), jnp.float32)

    params = {
        # conv weights in HWIO
        "w1": jax.random.normal(kw1, (3, 3, C, C), jnp.float32) * 0.1,
        "w2": jax.random.normal(kw2, (3, 3, C, C), jnp.float32) * 0.1,
        # BN params: (gamma, beta, running_mean, running_var)
        "bn1": (jnp.ones((C,), jnp.float32) + 0.1 * jax.random.normal(kb1, (C,)),
                0.1 * jax.random.normal(km1, (C,)),
                0.1 * jax.random.normal(kv1, (C,)),
                jnp.abs(jax.random.normal(kb2, (C,))) + 0.5),
        "bn2": (jnp.ones((C,), jnp.float32) + 0.1 * jax.random.normal(km2, (C,)),
                0.1 * jax.random.normal(kv2, (C,)),
                0.1 * jax.random.normal(kb1, (C,)),
                jnp.abs(jax.random.normal(kw1, (C,))) + 0.5),
    }

    ref = jax.block_until_ready(basic_block_reference(x, params))

    # f32 MXU operands: tight check.
    out_f32 = jax.block_until_ready(
        basic_block_forward(x, params, compute_dtype=jnp.float32))
    np.testing.assert_allclose(np.asarray(out_f32), np.asarray(ref),
                               rtol=1e-3, atol=1e-3)

    # bf16 MXU operands (default; 2x MXU throughput on v6e/v7x), f32 epilogue:
    # looser tolerance due to bf16 operand quantization.
    out_bf16 = jax.block_until_ready(basic_block_forward(x, params))
    np.testing.assert_allclose(np.asarray(out_bf16), np.asarray(ref),
                               rtol=2e-2, atol=2e-2)

    assert out_bf16.shape == (N, C, H, W)
    print("KERNEL_OK")
</pallas_src>

<mosaic_0001>
module attributes {stable_mosaic.version = 11 : i64} {
  func.func @_basic_block_kernel(%arg0: i32, %arg1: memref<2x8x384xf32, #tpu.memory_space<vmem>>, %arg2: memref<8x72xf32, #tpu.memory_space<vmem>>, %arg3: memref<8x1xf32, #tpu.memory_space<vmem>>, %arg4: memref<8x72xf32, #tpu.memory_space<vmem>>, %arg5: memref<8x1xf32, #tpu.memory_space<vmem>>, %arg6: memref<1x384xf32, #tpu.memory_space<vmem>>, %arg7: memref<2x8x384xf32, #tpu.memory_space<vmem>>) attributes {dimension_semantics = [#tpu.dimension_semantics<parallel>], iteration_bounds = array<i64: 1>, scalar_prefetch = 0 : i64, scratch_operands = 0 : i64, tpu.core_type = #tpu.core_type<tc>, window_params = [{transform_indices = @transform_0, window_bounds = array<i64: 2, 8, 384>}, {pipeline_mode = #tpu.pipeline_mode<synchronous>, transform_indices = @transform_1, window_bounds = array<i64: 8, 72>}, {pipeline_mode = #tpu.pipeline_mode<synchronous>, transform_indices = @transform_2, window_bounds = array<i64: 8, 1>}, {pipeline_mode = #tpu.pipeline_mode<synchronous>, transform_indices = @transform_3, window_bounds = array<i64: 8, 72>}, {pipeline_mode = #tpu.pipeline_mode<synchronous>, transform_indices = @transform_4, window_bounds = array<i64: 8, 1>}, {pipeline_mode = #tpu.pipeline_mode<synchronous>, transform_indices = @transform_5, window_bounds = array<i64: 1, 384>}, {transform_indices = @transform_6, window_bounds = array<i64: 2, 8, 384>}]} {
    %c0 = arith.constant 0 : index
    %c0_0 = arith.constant 0 : index
    %0 = vector.load %arg2[%c0, %c0_0] : memref<8x72xf32, #tpu.memory_space<vmem>>, vector<8x72xf32>
    %c0_1 = arith.constant 0 : index
    %c0_2 = arith.constant 0 : index
    %1 = vector.load %arg4[%c0_1, %c0_2] : memref<8x72xf32, #tpu.memory_space<vmem>>, vector<8x72xf32>
    %c0_3 = arith.constant 0 : index
    %c0_4 = arith.constant 0 : index
    %2 = vector.load %arg3[%c0_3, %c0_4] : memref<8x1xf32, #tpu.memory_space<vmem>>, vector<8x1xf32>
    %c0_5 = arith.constant 0 : index
    %c0_6 = arith.constant 0 : index
    %3 = vector.load %arg5[%c0_5, %c0_6] : memref<8x1xf32, #tpu.memory_space<vmem>>, vector<8x1xf32>
    %c0_7 = arith.constant 0 : index
    %c0_8 = arith.constant 0 : index
    %4 = vector.load %arg6[%c0_7, %c0_8] : memref<1x384xf32, #tpu.memory_space<vmem>>, vector<1x384xf32>
    %c0_9 = arith.constant 0 : index
    %c0_10 = arith.constant 0 : index
    %c0_11 = arith.constant 0 : index
    %5 = vector.load %arg1[%c0_9, %c0_10, %c0_11] : memref<2x8x384xf32, #tpu.memory_space<vmem>>, vector<1x8x384xf32>
    %6 = vector.shape_cast %5 : vector<1x8x384xf32> to vector<8x384xf32>
    %c19_i32 = arith.constant 19 : i32
    %7 = tpu.dynamic_rotate %6 by %c19_i32 dim 1 : vector<8x384xf32>, i32 -> vector<8x384xf32>
    %c18_i32 = arith.constant 18 : i32
    %8 = tpu.dynamic_rotate %6 by %c18_i32 dim 1 : vector<8x384xf32>, i32 -> vector<8x384xf32>
    %c17_i32 = arith.constant 17 : i32
    %9 = tpu.dynamic_rotate %6 by %c17_i32 dim 1 : vector<8x384xf32>, i32 -> vector<8x384xf32>
    %c1_i32 = arith.constant 1 : i32
    %10 = tpu.dynamic_rotate %6 by %c1_i32 dim 1 : vector<8x384xf32>, i32 -> vector<8x384xf32>
    %c383_i32 = arith.constant 383 : i32
    %11 = tpu.dynamic_rotate %6 by %c383_i32 dim 1 : vector<8x384xf32>, i32 -> vector<8x384xf32>
    %c367_i32 = arith.constant 367 : i32
    %12 = tpu.dynamic_rotate %6 by %c367_i32 dim 1 : vector<8x384xf32>, i32 -> vector<8x384xf32>
    %c366_i32 = arith.constant 366 : i32
    %13 = tpu.dynamic_rotate %6 by %c366_i32 dim 1 : vector<8x384xf32>, i32 -> vector<8x384xf32>
    %c365_i32 = arith.constant 365 : i32
    %14 = tpu.dynamic_rotate %6 by %c365_i32 dim 1 : vector<8x384xf32>, i32 -> vector<8x384xf32>
    %15 = tpu.concatenate %7, %8, %9, %10, %6, %11, %12, %13, %14 in 0 : vector<8x384xf32>, vector<8x384xf32>, vector<8x384xf32>, vector<8x384xf32>, vector<8x384xf32>, vector<8x384xf32>, vector<8x384xf32>, vector<8x384xf32>, vector<8x384xf32> -> vector<72x384xf32>
    %cst = arith.constant dense<0.000000e+00> : vector<8x384xf32>
    %16 = tpu.matmul %0, %15, %cst {dimension_numbers = #tpu.dot_dimension_numbers<[1], [0], [0], [1], [0, 0, 1, 1], [], []>} : vector<8x72xf32>, vector<72x384xf32>, vector<8x384xf32> -> vector<8x384xf32>
    %17 = vector.broadcast %2 : vector<8x1xf32> to vector<8x384xf32>
    %18 = arith.addf %16, %17 : vector<8x384xf32>
    %cst_12 = arith.constant 0.000000e+00 : f32
    %19 = vector.broadcast %cst_12 : f32 to vector<8x384xf32>
    %20 = arith.maximumf %18, %19 : vector<8x384xf32>
    %21 = vector.broadcast %4 : vector<1x384xf32> to vector<8x384xf32>
    %22 = arith.mulf %20, %21 : vector<8x384xf32>
    %c19_i32_13 = arith.constant 19 : i32
    %23 = tpu.dynamic_rotate %22 by %c19_i32_13 dim 1 : vector<8x384xf32>, i32 -> vector<8x384xf32>
    %c18_i32_14 = arith.constant 18 : i32
    %24 = tpu.dynamic_rotate %22 by %c18_i32_14 dim 1 : vector<8x384xf32>, i32 -> vector<8x384xf32>
    %c17_i32_15 = arith.constant 17 : i32
    %25 = tpu.dynamic_rotate %22 by %c17_i32_15 dim 1 : vector<8x384xf32>, i32 -> vector<8x384xf32>
    %c1_i32_16 = arith.constant 1 : i32
    %26 = tpu.dynamic_rotate %22 by %c1_i32_16 dim 1 : vector<8x384xf32>, i32 -> vector<8x384xf32>
    %c383_i32_17 = arith.constant 383 : i32
    %27 = tpu.dynamic_rotate %22 by %c383_i32_17 dim 1 : vector<8x384xf32>, i32 -> vector<8x384xf32>
    %c367_i32_18 = arith.constant 367 : i32
    %28 = tpu.dynamic_rotate %22 by %c367_i32_18 dim 1 : vector<8x384xf32>, i32 -> vector<8x384xf32>
    %c366_i32_19 = arith.constant 366 : i32
    %29 = tpu.dynamic_rotate %22 by %c366_i32_19 dim 1 : vector<8x384xf32>, i32 -> vector<8x384xf32>
    %c365_i32_20 = arith.constant 365 : i32
    %30 = tpu.dynamic_rotate %22 by %c365_i32_20 dim 1 : vector<8x384xf32>, i32 -> vector<8x384xf32>
    %31 = tpu.concatenate %23, %24, %25, %26, %22, %27, %28, %29, %30 in 0 : vector<8x384xf32>, vector<8x384xf32>, vector<8x384xf32>, vector<8x384xf32>, vector<8x384xf32>, vector<8x384xf32>, vector<8x384xf32>, vector<8x384xf32>, vector<8x384xf32> -> vector<72x384xf32>
    %cst_21 = arith.constant dense<0.000000e+00> : vector<8x384xf32>
    %32 = tpu.matmul %1, %31, %cst_21 {dimension_numbers = #tpu.dot_dimension_numbers<[1], [0], [0], [1], [0, 0, 1, 1], [], []>} : vector<8x72xf32>, vector<72x384xf32>, vector<8x384xf32> -> vector<8x384xf32>
    %33 = vector.broadcast %3 : vector<8x1xf32> to vector<8x384xf32>
    %34 = arith.addf %32, %33 : vector<8x384xf32>
    %35 = arith.addf %34, %6 : vector<8x384xf32>
    %cst_22 = arith.constant 0.000000e+00 : f32
    %36 = vector.broadcast %cst_22 : f32 to vector<8x384xf32>
    %37 = arith.maximumf %35, %36 : vector<8x384xf32>
    %c0_23 = arith.constant 0 : index
    %c0_24 = arith.constant 0 : index
    %c0_25 = arith.constant 0 : index
    %38 = vector.load %arg7[%c0_23, %c0_24, %c0_25] : memref<2x8x384xf32, #tpu.memory_space<vmem>>, vector<1x8x384xf32>
    %39 = vector.shape_cast %38 : vector<1x8x384xf32> to vector<8x384xf32>
    %40 = vector.shape_cast %37 : vector<8x384xf32> to vector<1x8x384xf32>
    tpu.vector_store %arg7[%c0_23, %c0_24, %c0_25], %40 {strides = array<i32>} : memref<2x8x384xf32, #tpu.memory_space<vmem>>, vector<1x8x384xf32>,
    %c1 = arith.constant 1 : index
    %c0_26 = arith.constant 0 : index
    %c0_27 = arith.constant 0 : index
    %41 = vector.load %arg1[%c1, %c0_26, %c0_27] : memref<2x8x384xf32, #tpu.memory_space<vmem>>, vector<1x8x384xf32>
    %42 = vector.shape_cast %41 : vector<1x8x384xf32> to vector<8x384xf32>
    %c19_i32_28 = arith.constant 19 : i32
    %43 = tpu.dynamic_rotate %42 by %c19_i32_28 dim 1 : vector<8x384xf32>, i32 -> vector<8x384xf32>
    %c18_i32_29 = arith.constant 18 : i32
    %44 = tpu.dynamic_rotate %42 by %c18_i32_29 dim 1 : vector<8x384xf32>, i32 -> vector<8x384xf32>
    %c17_i32_30 = arith.constant 17 : i32
    %45 = tpu.dynamic_rotate %42 by %c17_i32_30 dim 1 : vector<8x384xf32>, i32 -> vector<8x384xf32>
    %c1_i32_31 = arith.constant 1 : i32
    %46 = tpu.dynamic_rotate %42 by %c1_i32_31 dim 1 : vector<8x384xf32>, i32 -> vector<8x384xf32>
    %c383_i32_32 = arith.constant 383 : i32
    %47 = tpu.dynamic_rotate %42 by %c383_i32_32 dim 1 : vector<8x384xf32>, i32 -> vector<8x384xf32>
    %c367_i32_33 = arith.constant 367 : i32
    %48 = tpu.dynamic_rotate %42 by %c367_i32_33 dim 1 : vector<8x384xf32>, i32 -> vector<8x384xf32>
    %c366_i32_34 = arith.constant 366 : i32
    %49 = tpu.dynamic_rotate %42 by %c366_i32_34 dim 1 : vector<8x384xf32>, i32 -> vector<8x384xf32>
    %c365_i32_35 = arith.constant 365 : i32
    %50 = tpu.dynamic_rotate %42 by %c365_i32_35 dim 1 : vector<8x384xf32>, i32 -> vector<8x384xf32>
    %51 = tpu.concatenate %43, %44, %45, %46, %42, %47, %48, %49, %50 in 0 : vector<8x384xf32>, vector<8x384xf32>, vector<8x384xf32>, vector<8x384xf32>, vector<8x384xf32>, vector<8x384xf32>, vector<8x384xf32>, vector<8x384xf32>, vector<8x384xf32> -> vector<72x384xf32>
    %cst_36 = arith.constant dense<0.000000e+00> : vector<8x384xf32>
    %52 = tpu.matmul %0, %51, %cst_36 {dimension_numbers = #tpu.dot_dimension_numbers<[1], [0], [0], [1], [0, 0, 1, 1], [], []>} : vector<8x72xf32>, vector<72x384xf32>, vector<8x384xf32> -> vector<8x384xf32>
    %53 = vector.broadcast %2 : vector<8x1xf32> to vector<8x384xf32>
    %54 = arith.addf %52, %53 : vector<8x384xf32>
    %cst_37 = arith.constant 0.000000e+00 : f32
    %55 = vector.broadcast %cst_37 : f32 to vector<8x384xf32>
    %56 = arith.maximumf %54, %55 : vector<8x384xf32>
    %57 = vector.broadcast %4 : vector<1x384xf32> to vector<8x384xf32>
    %58 = arith.mulf %56, %57 : vector<8x384xf32>
    %c19_i32_38 = arith.constant 19 : i32
    %59 = tpu.dynamic_rotate %58 by %c19_i32_38 dim 1 : vector<8x384xf32>, i32 -> vector<8x384xf32>
    %c18_i32_39 = arith.constant 18 : i32
    %60 = tpu.dynamic_rotate %58 by %c18_i32_39 dim 1 : vector<8x384xf32>, i32 -> vector<8x384xf32>
    %c17_i32_40 = arith.constant 17 : i32
    %61 = tpu.dynamic_rotate %58 by %c17_i32_40 dim 1 : vector<8x384xf32>, i32 -> vector<8x384xf32>
    %c1_i32_41 = arith.constant 1 : i32
    %62 = tpu.dynamic_rotate %58 by %c1_i32_41 dim 1 : vector<8x384xf32>, i32 -> vector<8x384xf32>
    %c383_i32_42 = arith.constant 383 : i32
    %63 = tpu.dynamic_rotate %58 by %c383_i32_42 dim 1 : vector<8x384xf32>, i32 -> vector<8x384xf32>
    %c367_i32_43 = arith.constant 367 : i32
    %64 = tpu.dynamic_rotate %58 by %c367_i32_43 dim 1 : vector<8x384xf32>, i32 -> vector<8x384xf32>
    %c366_i32_44 = arith.constant 366 : i32
    %65 = tpu.dynamic_rotate %58 by %c366_i32_44 dim 1 : vector<8x384xf32>, i32 -> vector<8x384xf32>
    %c365_i32_45 = arith.constant 365 : i32
    %66 = tpu.dynamic_rotate %58 by %c365_i32_45 dim 1 : vector<8x384xf32>, i32 -> vector<8x384xf32>
    %67 = tpu.concatenate %59, %60, %61, %62, %58, %63, %64, %65, %66 in 0 : vector<8x384xf32>, vector<8x384xf32>, vector<8x384xf32>, vector<8x384xf32>, vector<8x384xf32>, vector<8x384xf32>, vector<8x384xf32>, vector<8x384xf32>, vector<8x384xf32> -> vector<72x384xf32>
    %cst_46 = arith.constant dense<0.000000e+00> : vector<8x384xf32>
    %68 = tpu.matmul %1, %67, %cst_46 {dimension_numbers = #tpu.dot_dimension_numbers<[1], [0], [0], [1], [0, 0, 1, 1], [], []>} : vector<8x72xf32>, vector<72x384xf32>, vector<8x384xf32> -> vector<8x384xf32>
    %69 = vector.broadcast %3 : vector<8x1xf32> to vector<8x384xf32>
    %70 = arith.addf %68, %69 : vector<8x384xf32>
    %71 = arith.addf %70, %42 : vector<8x384xf32>
    %cst_47 = arith.constant 0.000000e+00 : f32
    %72 = vector.broadcast %cst_47 : f32 to vector<8x384xf32>
    %73 = arith.maximumf %71, %72 : vector<8x384xf32>
    %c1_48 = arith.constant 1 : index
    %c0_49 = arith.constant 0 : index
    %c0_50 = arith.constant 0 : index
    %74 = vector.load %arg7[%c1_48, %c0_49, %c0_50] : memref<2x8x384xf32, #tpu.memory_space<vmem>>, vector<1x8x384xf32>
    %75 = vector.shape_cast %74 : vector<1x8x384xf32> to vector<8x384xf32>
    %76 = vector.shape_cast %73 : vector<8x384xf32> to vector<1x8x384xf32>
    tpu.vector_store %arg7[%c1_48, %c0_49, %c0_50], %76 {strides = array<i32>} : memref<2x8x384xf32, #tpu.memory_space<vmem>>, vector<1x8x384xf32>,
    return
  }
  func.func @transform_0(%arg0: i32) -> (i32, i32, i32) {
    %c0_i32 = arith.constant 0 : i32
    %c0_i32_0 = arith.constant 0 : i32
    %c0_i32_1 = arith.constant 0 : i32
    return %arg0, %c0_i32, %c0_i32_0 : i32, i32, i32
  }
  func.func @transform_1(%arg0: i32) -> (i32, i32) {
    %c0_i32 = arith.constant 0 : i32
    %c0_i32_0 = arith.constant 0 : i32
    %c0_i32_1 = arith.constant 0 : i32
    return %c0_i32, %c0_i32_0 : i32, i32
  }
  func.func @transform_2(%arg0: i32) -> (i32, i32) {
    %c0_i32 = arith.constant 0 : i32
    %c0_i32_0 = arith.constant 0 : i32
    %c0_i32_1 = arith.constant 0 : i32
    return %c0_i32, %c0_i32_0 : i32, i32
  }
  func.func @transform_3(%arg0: i32) -> (i32, i32) {
    %c0_i32 = arith.constant 0 : i32
    %c0_i32_0 = arith.constant 0 : i32
    %c0_i32_1 = arith.constant 0 : i32
    return %c0_i32, %c0_i32_0 : i32, i32
  }
  func.func @transform_4(%arg0: i32) -> (i32, i32) {
    %c0_i32 = arith.constant 0 : i32
    %c0_i32_0 = arith.constant 0 : i32
    %c0_i32_1 = arith.constant 0 : i32
    return %c0_i32, %c0_i32_0 : i32, i32
  }
  func.func @transform_5(%arg0: i32) -> (i32, i32) {
    %c0_i32 = arith.constant 0 : i32
    %c0_i32_0 = arith.constant 0 : i32
    %c0_i32_1 = arith.constant 0 : i32
    return %c0_i32, %c0_i32_0 : i32, i32
  }
  func.func @transform_6(%arg0: i32) -> (i32, i32, i32) {
    %c0_i32 = arith.constant 0 : i32
    %c0_i32_0 = arith.constant 0 : i32
    %c0_i32_1 = arith.constant 0 : i32
    return %arg0, %c0_i32, %c0_i32_0 : i32, i32, i32
  }
}

</mosaic_0001>

<bundles_post_ra>
// kernel: tpu_custom_call.1
= control target key start
LH: loop header
LB: loop body
LE: loop exit
PB: predicated region body
PF: predicated region fallthrough
CT: control target
= control target key end

     0   :  { %11 = vsyncpa [#allocation3], 0  ;;  %s2042_s0 = inlined_call_operand.hbm [shape: f32[2,8,384], index: 0, kind: input, shape index: {}]   ;;  %s2043_s1 = inlined_call_operand.vmem [shape: f32[8,72], index: 1, kind: input, shape index: {}]   ;;  %s2044_s2 = inlined_call_operand.vmem [shape: f32[8,1], index: 2, kind: input, shape index: {}]   ;;  %s2045_s3 = inlined_call_operand.vmem [shape: f32[8,72], index: 3, kind: input, shape index: {}]   ;;  %s2046_s4 = inlined_call_operand.vmem [shape: f32[8,1], index: 4, kind: input, shape index: {}]   ;;  %s2047_s5 = inlined_call_operand.vmem [shape: f32[1,384], index: 5, kind: input, shape index: {}]   ;;  %s2048_s6 = inlined_call_operand.hbm [shape: f32[2,8,384], index: 6, kind: output, shape index: {}]  }
   0x1   :  { %12 = vsyncpa [#allocation4], 0  ;;  %s1461_s21 = smov [#allocation2]   ;;  %s1413_s25 = scalar_lea.hbm %s2042_s0, 768 }
   0x2   :  { %s18_s22 = sshll.u32 %s1461_s21, 4  ;;  %p1414_p0 = scmp.ne.s32.totalorder %s2042_s0, %s1413_s25  ;;  %s19_s22 = int_to_ptr.vmem [resolvable:$true] %s18_s22 }
   0x3   :  { %p1417_p1 = scmp.lt.u32.totalorder %s1413_s25, %s2042_s0 }
   0x5   :  { %p1419_p2 = pnand %p1417_p1, %p1414_p0 }
   0x7   :  { %1422 = shalt.err (!%p1419_p2)
}
   0x8   :  { %s1423_s30 = scalar_lea.vmem %s19_s22, 768  ;;  %p1428_p4 = scmp.lt.s32.totalorder %s19_s22, %s19_s22 }
   0x9   :  { %p1424_p3 = scmp.ne.s32.totalorder %s19_s22, %s1423_s30  ;;  %p1429_p5 = scmp.lt.s32.totalorder %s1423_s30, %s1423_s30 }
   0xb   :  { %p1430_p6 = por %p1429_p5, %p1428_p4 }
   0xd   :  { %p1431_p7 = pnand %p1430_p6, %p1424_p3 }
   0xf   :  { %1434 = shalt.err (!%p1431_p7)
}
  0x10   :  { %s1462_s7 = smov 384   ;;  %s1463_s8 = smov 24  }
  0x11   :  { %24 = dma.hbm_to_vmem [thread:$0]  %s2042_s0, 768, %s19_s22, [#allocation3], %s1462_s7, %s1462_s7, %s1463_s8  }
  0x12   :  { %1457 = dma.done.wait [#allocation3], 768  }
  0x13   :  { %1458 = vsyncadd [#allocation3], 4294966528  ;;  %v1464_v0 = vmov 0.0|0.0   ;;  %v1528_v1 = vld [vmem:[#allocation2 + $0x10] sm:$0xff]  ;;  %v1530_v2 = vld [vmem:[#allocation2] sm:$0xff]  ;;  %s1465_s11 = smov 19   ;;  %v52_v9 = vlaneseq }
  0x14   :  { %1141 = vmatprep.subr.bf16.mxu1 %v1464_v0  ;;  %v1532_v3 = vld [vmem:[#allocation2 + $0x8] sm:$0xff]  ;;  %50 = vrot.lane.b32.xlu1 %v1528_v1, %s1465_s11  ;;  %s1466_s0 = smov 18   ;;  %s1467_s12 = smov 1   ;;  %v1471_v6 = vmov 0.0   ;;  %vm1473_vm0 = vmmov 0   ;;  %v1474_v7 = vmov 0  }
  0x15   :  { %v1253_v4 = vpack.i.bf16 %v1532_v3, %v1530_v2  ;;  %s1468_s13 = smov 17   ;;  %v1273_v5 = vpack.i.bf16 %v1528_v1, %v1532_v3  ;;  %s1469_s14 = smov 127   ;;  %201 = vmatprep.mubr.f32.mxu0 %v1471_v6  ;;  %1059 = vmatprep.mubr.msk.f32.mxu1 %vm1473_vm0, %v1471_v6  ;;  %v40_v8 = vld [vmem:[%s2044_s2] sm:$0xff]  ;;  %v1572_v11 = vand.u32 127, %v52_v9  ;;  %vm133_vm9 = vcmask 588800  }
  0x16   :  { %s1470_s15 = smov 110   ;;  %s1472_s16 = smov 111   ;;  %1409 = vset.pattern.permute.xlu0 %v1474_v7  ;;  %1288 = vset.pattern.permute.xlu1 %v1474_v7 }
  0x17   :  { %1254 = vrot.lane.b32.xlu0 %v1253_v4, %s1465_s11  ;;  %s1475_s17 = smov 109   ;;  %vm54_vm1 = vcmp.lt.s32.totalorder %v1572_v11, 19  ;;  %vm64_vm2 = vcmp.lt.s32.totalorder %v1572_v11, 18  ;;  %vm84_vm3 = vcmp.lt.s32.totalorder %v1572_v11, 1  ;;  %vm74_vm4 = vcmp.lt.s32.totalorder %v1572_v11, 17 }
  0x18   :  { %62 = vrot.lane.b32.xlu1 %v1528_v1, %s1466_s0  ;;  %vm94_vm5 = vcmp.lt.s32.totalorder %v1572_v11, 127  ;;  %vm114_vm6 = vcmp.lt.s32.totalorder %v1572_v11, 110  ;;  %vm104_vm7 = vcmp.lt.s32.totalorder %v1572_v11, 111  ;;  %vm124_vm8 = vcmp.lt.s32.totalorder %v1572_v11, 109 }
  0x1b   :  { %1259 = vrot.lane.b32.xlu0 %v1253_v4, %s1466_s0 }
  0x1c   :  { %1269 = vrot.lane.b32.xlu1 %v1253_v4, %s1467_s12 }
  0x1f   :  { %1264 = vrot.lane.b32.xlu0 %v1253_v4, %s1468_s13 }
  0x20   :  { %82 = vrot.lane.b32.xlu1 %v1528_v1, %s1467_s12 }
  0x23   :  { %72 = vrot.lane.b32.xlu0 %v1528_v1, %s1468_s13 }
  0x24   :  { %88 = vrot.lane.b32.xlu1 %v1530_v2, %s1469_s14 }
  0x27   :  { %1274 = vrot.lane.b32.xlu0 %v1273_v5, %s1469_s14 }
  0x28   :  { %1284 = vrot.lane.b32.xlu1 %v1273_v5, %s1470_s15 }
  0x2b   :  { %1279 = vrot.lane.b32.xlu0 %v1273_v5, %s1472_s16 }
  0x2c   :  { %108 = vrot.lane.b32.xlu1 %v1530_v2, %s1470_s15 }
  0x2f   :  { %98 = vrot.lane.b32.xlu0 %v1530_v2, %s1472_s16 }
  0x30   :  { %122 = vrot.lane.b32.xlu1 %v1528_v1, %s1475_s17 }
  0x33   :  { %120 = vrot.lane.b32.xlu0 %v1532_v3, %s1475_s17 }
  0x34   :  { %130 = vperm.xlu1 %1288, %v40_v8  }
  0x37   :  { %118 = vrot.lane.b32.xlu0 %v1530_v2, %s1475_s17 }
  0x86   :  { %v51_v10 = vpop.permute.xlu1 %50 }
  0x89   :  { %v1255_v12 = vpop.permute.xlu0 %1254 }
  0x8a   :  { %v1257_v13 = vunpack.i.h.bf16 %v1255_v12  ;;  %v1256_v14 = vunpack.i.l.bf16 %v1255_v12  ;;  %v63_v15 = vpop.permute.xlu1 %62 }
  0x8c   :  { %v56_v20 = vsel %vm54_vm1, %v1256_v14, %v1257_v13  ;;  %v55_v21 = vsel %vm54_vm1, %v1257_v13, %v51_v10  ;;  %v57_v29 = vsel %vm54_vm1, %v51_v10, %v1256_v14 }
  0x8d   :  { %v1260_v16 = vpop.permute.xlu0 %1259 }
  0x8e   :  { %v1262_v17 = vunpack.i.h.bf16 %v1260_v16  ;;  %v1261_v18 = vunpack.i.l.bf16 %v1260_v16  ;;  %v1270_v19 = vpop.permute.xlu1 %1269  ;;  %v1636_v16 = vld [vmem:[%s2043_s1] sm:$0xff] }
  0x8f   :  { %v1272_v22 = vunpack.i.h.bf16 %v1270_v19  ;;  %v1271_v23 = vunpack.i.l.bf16 %v1270_v19  ;;  %v1650_v19 = vld [vmem:[#allocation2 + $0x20] sm:$0xff] }
  0x90   :  { %v66_v24 = vsel %vm64_vm2, %v1261_v18, %v1262_v17  ;;  %v65_v25 = vsel %vm64_vm2, %v1262_v17, %v63_v15  ;;  %v67_v30 = vsel %vm64_vm2, %v63_v15, %v1261_v18 }
  0x91   :  { %v1265_v26 = vpop.permute.xlu0 %1264  ;;  %v1125_v27 = vpack.c.bf16 %v66_v24, %v56_v20  ;;  %v1142_v28 = vpack.c.bf16 %v65_v25, %v55_v21  ;;  %v1127_v33 = vpack.c.bf16 %v67_v30, %v57_v29  ;;  %v86_v34 = vsel %vm84_vm3, %v1271_v23, %v1272_v22  ;;  %v1652_v20 = vld [vmem:[#allocation2 + $0x28] sm:$0xff]  ;;  %v42_v25 = vld [vmem:[%s2047_s5] sm:$0x7] }
  0x92   :  { %v1267_v31 = vunpack.i.h.bf16 %v1265_v26  ;;  %v1266_v32 = vunpack.i.l.bf16 %v1265_v26  ;;  %v83_v35 = vpop.permute.xlu1 %82  ;;  %v1289_v21 = vpack.i.bf16 %v1652_v20, %v1650_v19 }
  0x93   :  { %1126 = vmatprep.subr.bf16.mxu0 %v1125_v27  ;;  %1143 = vmatpush3.bf16.msra.mxu1 %v1142_v28  ;;  %v85_v36 = vsel %vm84_vm3, %v1272_v22, %v83_v35  ;;  %v87_v37 = vsel %vm84_vm3, %v83_v35, %v1271_v23  ;;  %v283_v22 = vshrl.u32 %v52_v9, 7 }
  0x94   :  { %1128 = vmatpush1.bf16.msra.mxu0 %v1127_v33  ;;  %v76_v38 = vsel %vm74_vm4, %v1266_v32, %v1267_v31  ;;  %1144 = vmatprep.subr.bf16.mxu1 %v1464_v0  ;;  %v1666_v33 = vld [vmem:[#allocation2 + $0x18] sm:$0xff] }
  0x95   :  { %v73_v39 = vpop.permute.xlu0 %72  ;;  %v1129_v40 = vpack.c.bf16 %v86_v34, %v76_v38  ;;  %1290 = vrot.lane.b32.xlu0 %v1289_v21, %s1465_s11  ;;  %v292_v23 = vsub.s32 2, %v283_v22  ;;  %v284_v34 = vsub.s32 0, %v283_v22  ;;  %v288_v35 = vsub.s32 1, %v283_v22 }
  0x96   :  { %v75_v41 = vsel %vm74_vm4, %v1267_v31, %v73_v39  ;;  %v77_v42 = vsel %vm74_vm4, %v73_v39, %v1266_v32  ;;  %v89_v45 = vpop.permute.xlu1 %88 }
  0x97   :  { %v1131_v43 = vpack.c.bf16 %v87_v37, %v77_v42  ;;  %v1145_v44 = vpack.c.bf16 %v85_v36, %v75_v41  ;;  %1130 = vmatprep.subr.bf16.mxu0 %v1129_v40  ;;  %v1664_v29 = vrot.slane %v42_v25, %v292_v23  ;;  %v1677_v39 = vrot.slane %v42_v25, %v284_v34 }
  0x98   :  { %v1679_v42 = vrot.slane %v42_v25, %v288_v35 }
  0x99   :  { %v1275_v46 = vpop.permute.xlu0 %1274  ;;  %1132 = vmatpush1.bf16.msra.mxu0 %v1131_v43  ;;  %1146 = vmatpush3.bf16.msra.mxu1 %v1145_v44 }
  0x9a   :  { %v1277_v47 = vunpack.i.h.bf16 %v1275_v46  ;;  %v1276_v48 = vunpack.i.l.bf16 %v1275_v46  ;;  %1147 = vmatprep.subr.bf16.mxu1 %v1464_v0  ;;  %v1285_v49 = vpop.permute.xlu1 %1284 }
  0x9b   :  { %v1287_v50 = vunpack.i.h.bf16 %v1285_v49  ;;  %v1286_v51 = vunpack.i.l.bf16 %v1285_v49 }
  0x9c   :  { %v95_v52 = vsel %vm94_vm5, %v1276_v48, %v1277_v47  ;;  %v97_v53 = vsel %vm94_vm5, %v1277_v47, %v89_v45  ;;  %v96_v57 = vsel %vm94_vm5, %v89_v45, %v1276_v48  ;;  %v1354_v47 = vpack.i.bf16 %v1650_v19, %v1666_v33 }
  0x9d   :  { %v1280_v54 = vpop.permute.xlu0 %1279  ;;  %v1133_v55 = vpack.c.bf16 %v95_v52, %v1532_v3  ;;  %v1148_v56 = vpack.c.bf16 %v97_v53, %v1528_v1  ;;  %v1135_v60 = vpack.c.bf16 %v96_v57, %v1530_v2  ;;  %v115_v61 = vsel %vm114_vm6, %v1286_v51, %v1287_v50 }
  0x9e   :  { %v1282_v58 = vunpack.i.h.bf16 %v1280_v54  ;;  %v1281_v59 = vunpack.i.l.bf16 %v1280_v54  ;;  %v109_v62 = vpop.permute.xlu1 %108 }
  0x9f   :  { %1134 = vmatprep.subr.bf16.mxu0 %v1133_v55  ;;  %1149 = vmatpush3.bf16.msra.mxu1 %v1148_v56  ;;  %v116_v63 = vsel %vm114_vm6, %v109_v62, %v1286_v51  ;;  %v117_v1 = vsel %vm114_vm6, %v1287_v50, %v109_v62 }
  0xa0   :  { %1136 = vmatpush1.bf16.msra.mxu0 %v1135_v60  ;;  %v105_v3 = vsel %vm104_vm7, %v1281_v59, %v1282_v58  ;;  %1150 = vmatprep.subr.bf16.mxu1 %v1464_v0 }
  0xa1   :  { %v99_v4 = vpop.permute.xlu0 %98  ;;  %v1137_v2 = vpack.c.bf16 %v115_v61, %v105_v3 }
  0xa2   :  { %v106_v5 = vsel %vm104_vm7, %v99_v4, %v1281_v59  ;;  %v107_v7 = vsel %vm104_vm7, %v1282_v58, %v99_v4  ;;  %v123_v12 = vpop.permute.xlu1 %122 }
  0xa3   :  { %v1139_v8 = vpack.c.bf16 %v116_v63, %v106_v5  ;;  %v1151_v10 = vpack.c.bf16 %v117_v1, %v107_v7  ;;  %1138 = vmatprep.subr.bf16.mxu0 %v1137_v2 }
  0xa5   :  { %v121_v13 = vpop.permute.xlu0 %120  ;;  %1140 = vmatpush1.bf16.msra.mxu0 %v1139_v8  ;;  %1152 = vmatpush3.bf16.msra.mxu1 %v1151_v10 }
  0xa6   :  { %v125_v14 = vsel %vm124_vm8, %v121_v13, %v123_v12  ;;  %1057 = vmatprep.subr.mxu1 %v1471_v6 }
  0xa7   :  { %153 = vmatprep.subr.mxu0 %v125_v14 }
  0xa9   :  { %v119_v15 = vpop.permute.xlu0 %118 }
  0xaa   :  { %v126_v17 = vsel %vm124_vm8, %v119_v15, %v121_v13  ;;  %v127_v18 = vsel %vm124_vm8, %v123_v12, %v119_v15 }
  0xab   :  { %154 = vmatpush1.msra.mxu0 %v126_v17  ;;  %1058 = vmatpush3.msra.mxu1 %v127_v18 }
  0xac   :  { %993 = vmatmul.mubr.msk.f32.vlgmr.msra.gmra.mrb[0].mxu0 %vm133_vm9, %v1636_v16  ;;  %1060 = vmatmul.mubr.msk.f32.vlgmr.msra.gmra.mrb[0].mxu1 %vm133_vm9, %v1636_v16 }
  0xad   :  { %1169 = vmatprep.subr.bf16.mxu1 %v1464_v0  ;;  %1080 = vmatprep.mubr.msk.f32.mxu1 %vm1473_vm0, %v1471_v6 }
  0xae   :  { %444 = vmatprep.mubr.f32.mxu0 %v1471_v6 }
  0xb3   :  { %v1658_v24 = vpop.permute.xlu1 %130 }
 0x107   :  { %v1735_v48 = vpop.permute.xlu0 %1290 }
 0x17f   :  { %v203_v26 = vpop.f32.mrb[0].mxu0  ;;  %v274_v27 = vpop.f32.mrb[0].mxu1 }
 0x180   :  { %v275_v28 = vadd.f32 %v274_v27, %v1658_v24  ;;  %v205_v30 = vpop.f32.mrb[1].mxu0  ;;  %v1061_v31 = vpop.f32.mrb[1].mxu1  ;;  %v204_v36 = vadd.f32 %v203_v26, %v1658_v24 }
 0x181   :  { %v206_v37 = vadd.f32 %v205_v30, %v1658_v24 }
 0x182   :  { %v280_v32 = vmax.f32 %v275_v28, 0.0  ;;  %v278_v40 = vmax.f32 %v204_v36, 0.0 }
 0x183   :  { %v279_v41 = vmax.f32 %v206_v37, 0.0 }
 0x184   :  { %v1669_v9 = vmul.f32 %v1664_v29, %v280_v32  ;;  %v1685_v43 = vmul.f32 %v1677_v39, %v278_v40 }
 0x185   :  { %v1688_v44 = vmul.f32 %v1679_v42, %v279_v41 }
 0x186   :  { %v1299_v38 = vpack.i.bf16 %v1666_v33, %v1669_v9 }
 0x187   :  { %v1309_v45 = vpack.i.bf16 %v1688_v44, %v1685_v43  ;;  %v1334_v46 = vpack.i.bf16 %v1669_v9, %v1688_v44 }
 0x188   :  { %1300 = vrot.lane.b32.xlu1 %v1299_v38, %s1466_s0  ;;  %1295 = vrot.lane.b32.xlu0 %v1299_v38, %s1465_s11 }
 0x18c   :  { %331 = vrot.lane.b32.xlu1 %v1669_v9, %s1467_s12  ;;  %1305 = vrot.lane.b32.xlu0 %v1299_v38, %s1468_s13 }
 0x190   :  { %367 = vrot.lane.b32.xlu1 %v1669_v9, %s1475_s17  ;;  %345 = vrot.lane.b32.xlu0 %v1685_v43, %s1472_s16 }
 0x194   :  { %1310 = vrot.lane.b32.xlu0 %v1309_v45, %s1465_s11  ;;  %336 = vrot.lane.b32.xlu1 %v1685_v43, %s1469_s14 }
 0x198   :  { %1320 = vrot.lane.b32.xlu0 %v1309_v45, %s1468_s13  ;;  %354 = vrot.lane.b32.xlu1 %v1685_v43, %s1470_s15 }
 0x19c   :  { %363 = vrot.lane.b32.xlu0 %v1685_v43, %s1475_s17  ;;  %1315 = vrot.lane.b32.xlu1 %v1309_v45, %s1466_s0 }
 0x1a0   :  { %1335 = vrot.lane.b32.xlu0 %v1334_v46, %s1469_s14  ;;  %1325 = vrot.lane.b32.xlu1 %v1309_v45, %s1467_s12 }
 0x1a4   :  { %1340 = vrot.lane.b32.xlu0 %v1334_v46, %s1472_s16  ;;  %1330 = vrot.lane.b32.xlu1 %v1289_v21, %s1466_s0 }
 0x1a8   :  { %1355 = vrot.lane.b32.xlu0 %v1354_v47, %s1467_s12  ;;  %1345 = vrot.lane.b32.xlu1 %v1334_v46, %s1470_s15 }
 0x1ac   :  { %365 = vrot.lane.b32.xlu0 %v1688_v44, %s1475_s17  ;;  %1350 = vrot.lane.b32.xlu1 %v1289_v21, %s1468_s13 }
 0x1b0   :  { %1360 = vrot.lane.b32.xlu0 %v1289_v21, %s1469_s14  ;;  %565 = vrot.lane.b32.xlu1 %v1652_v20, %s1467_s12 }
 0x1b4   :  { %1365 = vrot.lane.b32.xlu0 %v1289_v21, %s1472_s16  ;;  %570 = vrot.lane.b32.xlu1 %v1666_v33, %s1469_s14 }
 0x1b8   :  { %579 = vrot.lane.b32.xlu0 %v1666_v33, %s1472_s16  ;;  %1370 = vrot.lane.b32.xlu1 %v1289_v21, %s1470_s15 }
 0x1bc   :  { %599 = vrot.lane.b32.xlu0 %v1650_v19, %s1475_s17  ;;  %588 = vrot.lane.b32.xlu1 %v1666_v33, %s1470_s15 }
 0x1c0   :  { %597 = vrot.lane.b32.xlu0 %v1666_v33, %s1475_s17  ;;  %601 = vrot.lane.b32.xlu1 %v1652_v20, %s1475_s17 }
 0x1fa   :  { %v1737_v49 = vpop.permute.xlu1 %1300  ;;  %v1739_v50 = vpop.permute.xlu0 %1295 }
 0x1fb   :  { %v1297_v61 = vunpack.i.l.bf16 %v1739_v50  ;;  %v1302_v1 = vunpack.i.l.bf16 %v1737_v49 }
 0x1fe   :  { %v332_v51 = vpop.permute.xlu1 %331  ;;  %v1741_v52 = vpop.permute.xlu0 %1305 }
 0x1ff   :  { %v1307_v22 = vunpack.i.l.bf16 %v1741_v52 }
 0x202   :  { %v1743_v53 = vpop.permute.xlu1 %367  ;;  %v1745_v54 = vpop.permute.xlu0 %345 }
 0x206   :  { %v1311_v55 = vpop.permute.xlu0 %1310  ;;  %v337_v56 = vpop.permute.xlu1 %336 }
 0x207   :  { %v1313_v59 = vunpack.i.h.bf16 %v1311_v55  ;;  %v1312_v60 = vunpack.i.l.bf16 %v1311_v55 }
 0x209   :  { %v306_v2 = vsel %vm54_vm1, %v1313_v59, %v1297_v61  ;;  %v308_v5 = vsel %vm54_vm1, %v1297_v61, %v1312_v60  ;;  %v307_v7 = vsel %vm54_vm1, %v1312_v60, %v1313_v59 }
 0x20a   :  { %v1321_v57 = vpop.permute.xlu0 %1320  ;;  %v1747_v58 = vpop.permute.xlu1 %354 }
 0x20b   :  { %v1323_v8 = vunpack.i.h.bf16 %v1321_v57  ;;  %v1322_v27 = vunpack.i.l.bf16 %v1321_v57 }
 0x20d   :  { %v324_v28 = vsel %vm74_vm4, %v1323_v8, %v1307_v22  ;;  %v326_v38 = vsel %vm74_vm4, %v1307_v22, %v1322_v27  ;;  %v325_v47 = vsel %vm74_vm4, %v1322_v27, %v1323_v8 }
 0x20e   :  { %v1750_v62 = vpop.permute.xlu0 %363  ;;  %v1316_v63 = vpop.permute.xlu1 %1315 }
 0x20f   :  { %v1318_v3 = vunpack.i.h.bf16 %v1316_v63  ;;  %v1317_v4 = vunpack.i.l.bf16 %v1316_v63  ;;  %v371_v27 = vsel %vm124_vm8, %v1743_v53, %v1750_v62 }
 0x211   :  { %v315_v10 = vsel %vm64_vm2, %v1318_v3, %v1302_v1  ;;  %v317_v12 = vsel %vm64_vm2, %v1302_v1, %v1317_v4  ;;  %v316_v13 = vsel %vm64_vm2, %v1317_v4, %v1318_v3 }
 0x212   :  { %v1170_v14 = vpack.c.bf16 %v315_v10, %v306_v2  ;;  %v1155_v15 = vpack.c.bf16 %v317_v12, %v308_v5  ;;  %v1336_v17 = vpop.permute.xlu0 %1335  ;;  %v1326_v18 = vpop.permute.xlu1 %1325  ;;  %v1153_v21 = vpack.c.bf16 %v316_v13, %v307_v7 }
 0x213   :  { %v1338_v23 = vunpack.i.h.bf16 %v1336_v17  ;;  %v1328_v25 = vunpack.i.h.bf16 %v1326_v18  ;;  %v1327_v26 = vunpack.i.l.bf16 %v1326_v18  ;;  %v1337_v30 = vunpack.i.l.bf16 %v1336_v17 }
 0x214   :  { %1154 = vmatprep.subr.bf16.mxu0 %v1153_v21  ;;  %1171 = vmatpush3.bf16.msra.mxu1 %v1170_v14  ;;  %v1293_v14 = vunpack.i.h.bf16 %v1735_v48 }
 0x215   :  { %v333_v31 = vsel %vm84_vm3, %v1328_v25, %v332_v51  ;;  %1156 = vmatpush1.bf16.msra.mxu0 %v1155_v15  ;;  %v335_v34 = vsel %vm84_vm3, %v332_v51, %v1327_v26  ;;  %1172 = vmatprep.subr.bf16.mxu1 %v1464_v0  ;;  %v344_v37 = vsel %vm94_vm5, %v1338_v23, %v337_v56  ;;  %v1292_v15 = vunpack.i.l.bf16 %v1735_v48 }
 0x216   :  { %v1173_v32 = vpack.c.bf16 %v333_v31, %v324_v28  ;;  %v1341_v35 = vpop.permute.xlu0 %1340  ;;  %v1772_v36 = vpop.permute.xlu1 %1330  ;;  %v334_v41 = vsel %vm84_vm3, %v1327_v26, %v1328_v25  ;;  %v1159_v45 = vpack.c.bf16 %v335_v34, %v326_v38  ;;  %v342_v51 = vsel %vm94_vm5, %v1337_v30, %v1338_v23 }
 0x217   :  { %v1343_v40 = vunpack.i.h.bf16 %v1341_v35  ;;  %v1342_v46 = vunpack.i.l.bf16 %v1341_v35  ;;  %v1176_v55 = vpack.c.bf16 %v344_v37, %v1669_v9  ;;  %v1157_v57 = vpack.c.bf16 %v334_v41, %v325_v47 }
 0x218   :  { %1174 = vmatpush3.bf16.msra.mxu1 %v1173_v32  ;;  %v343_v1 = vsel %vm94_vm5, %v337_v56, %v1337_v30  ;;  %v1161_v4 = vpack.c.bf16 %v342_v51, %v1688_v44  ;;  %v1333_v2 = vunpack.i.h.bf16 %v1772_v36  ;;  %v1332_v7 = vunpack.i.l.bf16 %v1772_v36 }
 0x219   :  { %1175 = vmatprep.subr.bf16.mxu1 %v1464_v0  ;;  %v353_v3 = vsel %vm104_vm7, %v1343_v40, %v1745_v54  ;;  %1158 = vmatprep.subr.bf16.mxu0 %v1157_v57  ;;  %v351_v56 = vsel %vm104_vm7, %v1342_v46, %v1343_v40  ;;  %v1163_v17 = vpack.c.bf16 %v343_v1, %v1685_v43  ;;  %v1824_v43 = vld [vmem:[%s2045_s3] sm:$0xff]  ;;  %v1298_v26 = vunpack.i.h.bf16 %v1739_v50 }
 0x21a   :  { %v1787_v59 = vpop.permute.xlu0 %1355  ;;  %v1346_v60 = vpop.permute.xlu1 %1345  ;;  %1160 = vmatpush1.bf16.msra.mxu0 %v1159_v45  ;;  %v352_v18 = vsel %vm104_vm7, %v1745_v54, %v1342_v46  ;;  %v549_v22 = vsel %vm64_vm2, %v1332_v7, %v1333_v2  ;;  %v540_v54 = vsel %vm54_vm1, %v1292_v15, %v1293_v14 }
 0x21b   :  { %v1348_v61 = vunpack.i.h.bf16 %v1346_v60  ;;  %v1347_v63 = vunpack.i.l.bf16 %v1346_v60  ;;  %1162 = vmatprep.subr.bf16.mxu0 %v1161_v4  ;;  %v1358_v30 = vunpack.i.h.bf16 %v1787_v59  ;;  %v1357_v31 = vunpack.i.l.bf16 %v1787_v59 }
 0x21c   :  { %1177 = vmatpush3.bf16.msra.mxu1 %v1176_v55  ;;  %v1198_v34 = vpack.c.bf16 %v549_v22, %v540_v54  ;;  %v541_v45 = vsel %vm54_vm1, %v1298_v26, %v1292_v15 }
 0x21d   :  { %v362_v9 = vsel %vm114_vm6, %v1348_v61, %v1747_v58  ;;  %1178 = vmatprep.subr.bf16.mxu1 %v1464_v0  ;;  %v360_v5 = vsel %vm114_vm6, %v1347_v63, %v1348_v61  ;;  %v361_v44 = vsel %vm114_vm6, %v1747_v58, %v1347_v63  ;;  %v1303_v58 = vunpack.i.h.bf16 %v1737_v49 }
 0x21e   :  { %v1179_v8 = vpack.c.bf16 %v362_v9, %v353_v3  ;;  %v366_v10 = vpop.permute.xlu0 %365  ;;  %v1808_v12 = vpop.permute.xlu1 %1350  ;;  %v1165_v13 = vpack.c.bf16 %v360_v5, %v351_v56  ;;  %v1167_v21 = vpack.c.bf16 %v361_v44, %v352_v18  ;;  %1164 = vmatpush1.bf16.msra.mxu0 %v1163_v17  ;;  %v1308_v49 = vunpack.i.h.bf16 %v1741_v52 }
 0x21f   :  { %v1352_v23 = vunpack.i.l.bf16 %v1808_v12  ;;  %v551_v28 = vsel %vm64_vm2, %v1333_v2, %v1303_v58  ;;  %v1353_v32 = vunpack.i.h.bf16 %v1808_v12  ;;  %v369_v50 = vsel %vm124_vm8, %v366_v10, %v1743_v53 }
 0x220   :  { %1180 = vmatpush3.bf16.msra.mxu1 %v1179_v8  ;;  %1166 = vmatprep.subr.bf16.mxu0 %v1165_v13  ;;  %v550_v52 = vsel %vm64_vm2, %v1303_v58, %v1332_v7  ;;  %v542_v53 = vsel %vm54_vm1, %v1293_v14, %v1298_v26  ;;  %v370_v46 = vsel %vm124_vm8, %v1750_v62, %v366_v10 }
 0x221   :  { %1078 = vmatprep.subr.mxu1 %v1471_v6  ;;  %v559_v41 = vsel %vm74_vm4, %v1308_v49, %v1352_v23  ;;  %v558_v47 = vsel %vm74_vm4, %v1352_v23, %v1353_v32  ;;  %v1181_v51 = vpack.c.bf16 %v550_v52, %v541_v45  ;;  %v568_v55 = vsel %vm84_vm3, %v1357_v31, %v1358_v30 }
 0x222   :  { %v1361_v48 = vpop.permute.xlu0 %1360  ;;  %v566_v25 = vpop.permute.xlu1 %565  ;;  %1168 = vmatpush1.bf16.msra.mxu0 %v1167_v21  ;;  %v1183_v57 = vpack.c.bf16 %v551_v28, %v542_v53  ;;  %v1185_v60 = vpack.c.bf16 %v568_v55, %v559_v41  ;;  %v560_v5 = vsel %vm74_vm4, %v1353_v32, %v1308_v49 }
 0x223   :  { %v1363_v35 = vunpack.i.h.bf16 %v1361_v48  ;;  %v1362_v36 = vunpack.i.l.bf16 %v1361_v48  ;;  %v567_v37 = vsel %vm84_vm3, %v1358_v30, %v566_v25  ;;  %396 = vmatprep.subr.mxu0 %v369_v50  ;;  %v569_v61 = vsel %vm84_vm3, %v566_v25, %v1357_v31 }
 0x224   :  { %1079 = vmatpush3.msra.mxu1 %v371_v27  ;;  %v1201_v59 = vpack.c.bf16 %v567_v37, %v558_v47  ;;  %v1187_v7 = vpack.c.bf16 %v569_v61, %v560_v5 }
 0x225   :  { %1081 = vmatmul.mubr.msk.f32.vlgmr.msra.gmra.mrb[2].mxu1 %vm133_vm9, %v1824_v43  ;;  %1197 = vmatprep.subr.bf16.mxu1 %v1464_v0  ;;  %v576_v3 = vsel %vm94_vm5, %v1362_v36, %v1363_v35 }
 0x226   :  { %v1366_v38 = vpop.permute.xlu0 %1365  ;;  %v571_v40 = vpop.permute.xlu1 %570  ;;  %1199 = vmatpush3.bf16.msra.mxu1 %v1198_v34  ;;  %1101 = vmatprep.mubr.msk.f32.mxu1 %vm1473_vm0, %v1471_v6  ;;  %v1189_v12 = vpack.c.bf16 %v576_v3, %v1650_v19 }
 0x227   :  { %1200 = vmatprep.subr.bf16.mxu1 %v1464_v0  ;;  %397 = vmatpush1.msra.mxu0 %v370_v46  ;;  %v578_v63 = vsel %vm94_vm5, %v1363_v35, %v571_v40  ;;  %v1368_v4 = vunpack.i.h.bf16 %v1366_v38  ;;  %v1367_v2 = vunpack.i.l.bf16 %v1366_v38  ;;  %v577_v10 = vsel %vm94_vm5, %v571_v40, %v1362_v36 }
 0x228   :  { %1182 = vmatprep.subr.bf16.mxu0 %v1181_v51  ;;  %995 = vmatmul.mubr.msk.f32.vlgmr.msra.gmra.mrb[2].mxu0 %vm133_vm9, %v1824_v43  ;;  %v1204_v8 = vpack.c.bf16 %v578_v63, %v1652_v20  ;;  %v1191_v23 = vpack.c.bf16 %v577_v10, %v1666_v33 }
 0x229   :  { %1184 = vmatpush1.bf16.msra.mxu0 %v1183_v57  ;;  %670 = vmatprep.mubr.f32.mxu0 %v1471_v6  ;;  %v585_v18 = vsel %vm104_vm7, %v1367_v2, %v1368_v4 }
 0x22a   :  { %v580_v62 = vpop.permute.xlu0 %579  ;;  %v1371_v1 = vpop.permute.xlu1 %1370  ;;  %1202 = vmatpush3.bf16.msra.mxu1 %v1201_v59  ;;  %1186 = vmatprep.subr.bf16.mxu0 %v1185_v60 }
 0x22b   :  { %v1373_v9 = vunpack.i.h.bf16 %v1371_v1  ;;  %v1372_v56 = vunpack.i.l.bf16 %v1371_v1  ;;  %1203 = vmatprep.subr.bf16.mxu1 %v1464_v0  ;;  %v587_v15 = vsel %vm104_vm7, %v1368_v4, %v580_v62  ;;  %v586_v48 = vsel %vm104_vm7, %v580_v62, %v1367_v2 }
 0x22d   :  { %v594_v44 = vsel %vm114_vm6, %v1372_v56, %v1373_v9  ;;  %1188 = vmatpush1.bf16.msra.mxu0 %v1187_v7 }
 0x22e   :  { %v600_v13 = vpop.permute.xlu0 %599  ;;  %v589_v14 = vpop.permute.xlu1 %588  ;;  %1205 = vmatpush3.bf16.msra.mxu1 %v1204_v8  ;;  %1190 = vmatprep.subr.bf16.mxu0 %v1189_v12  ;;  %v1193_v22 = vpack.c.bf16 %v594_v44, %v585_v18 }
 0x22f   :  { %v596_v17 = vsel %vm114_vm6, %v1373_v9, %v589_v14  ;;  %v595_v21 = vsel %vm114_vm6, %v589_v14, %v1372_v56  ;;  %1206 = vmatprep.subr.bf16.mxu1 %v1464_v0 }
 0x230   :  { %v1207_v58 = vpack.c.bf16 %v596_v17, %v587_v15  ;;  %v1195_v54 = vpack.c.bf16 %v595_v21, %v586_v48 }
 0x231   :  { %1192 = vmatpush1.bf16.msra.mxu0 %v1191_v23 }
 0x232   :  { %v602_v25 = vpop.permute.xlu1 %601  ;;  %v598_v26 = vpop.permute.xlu0 %597  ;;  %1208 = vmatpush3.bf16.msra.mxu1 %v1207_v58  ;;  %1194 = vmatprep.subr.bf16.mxu0 %v1193_v22 }
 0x233   :  { %v605_v49 = vsel %vm124_vm8, %v602_v25, %v598_v26  ;;  %1099 = vmatprep.subr.mxu1 %v1471_v6  ;;  %v603_v27 = vsel %vm124_vm8, %v600_v13, %v602_v25  ;;  %v604_v28 = vsel %vm124_vm8, %v598_v26, %v600_v13 }
 0x235   :  { %1196 = vmatpush1.bf16.msra.mxu0 %v1195_v54 }
 0x236   :  { %1100 = vmatpush3.msra.mxu1 %v605_v49  ;;  %622 = vmatprep.subr.mxu0 %v603_v27 }
 0x237   :  { %1102 = vmatmul.mubr.msk.f32.vlgmr.msra.gmra.mrb[4].mxu1 %vm133_vm9, %v1636_v16  ;;  %1225 = vmatprep.subr.bf16.mxu1 %v1464_v0 }
 0x238   :  { %1122 = vmatprep.mubr.msk.f32.mxu1 %vm1473_vm0, %v1471_v6 }
 0x239   :  { %623 = vmatpush1.msra.mxu0 %v604_v28 }
 0x23a   :  { %997 = vmatmul.mubr.msk.f32.vlgmr.msra.gmra.mrb[4].mxu0 %vm133_vm9, %v1636_v16 }
 0x23b   :  { %889 = vmatprep.mubr.f32.mxu0 %v1471_v6 }
 0x2f8   :  { %v1910_v30 = vpop.f32.mrb[2].mxu1 }
 0x2f9   :  { %v1082_v31 = vpop.f32.mrb[3].mxu1 }
 0x2fb   :  { %v1912_v32 = vpop.f32.mrb[2].mxu0 }
 0x2fc   :  { %v1914_v34 = vpop.f32.mrb[3].mxu0 }
 0x30a   :  { %v743_v50 = vpop.f32.mrb[4].mxu1 }
 0x30b   :  { %v744_v52 = vadd.f32 %v743_v50, %v1658_v24  ;;  %v1103_v35 = vpop.f32.mrb[5].mxu1 }
 0x30d   :  { %v749_v36 = vmax.f32 %v744_v52, 0.0  ;;  %v672_v37 = vpop.f32.mrb[4].mxu0 }
 0x30e   :  { %v673_v16 = vadd.f32 %v672_v37, %v1658_v24  ;;  %v674_v40 = vpop.f32.mrb[5].mxu0 }
 0x30f   :  { %v1918_v38 = vmul.f32 %v749_v36, %v1664_v29  ;;  %v675_v41 = vadd.f32 %v674_v40, %v1658_v24 }
 0x310   :  { %v747_v53 = vmax.f32 %v673_v16, 0.0 }
 0x311   :  { %766 = vrot.lane.b32.xlu0 %v1918_v38, %s1466_s0  ;;  %757 = vrot.lane.b32.xlu1 %v1918_v38, %s1465_s11  ;;  %v748_v45 = vmax.f32 %v675_v41, 0.0 }
 0x312   :  { %v1927_v46 = vmul.f32 %v747_v53, %v1677_v39  ;;  %v41_v39 = vld [vmem:[%s2046_s4] sm:$0xff]  ;;  %s1476_s4 = smov [#allocation5]  }
 0x313   :  { %v1930_v47 = vmul.f32 %v748_v45, %v1679_v42  ;;  %s981_s24 = sshll.u32 %s1476_s4, 4  ;;  %s982_s24 = int_to_ptr.vmem [resolvable:$true] %s981_s24 }
 0x314   :  { %s1435_s25 = scalar_lea.vmem %s982_s24, 768  ;;  %p1440_p9 = scmp.lt.s32.totalorder %s982_s24, %s982_s24 }
 0x315   :  { %784 = vrot.lane.b32.xlu0 %v1918_v38, %s1467_s12  ;;  %775 = vrot.lane.b32.xlu1 %v1918_v38, %s1468_s13  ;;  %v1379_v24 = vpack.i.bf16 %v1930_v47, %v1927_v46  ;;  %v1404_v29 = vpack.i.bf16 %v1918_v38, %v1930_v47  ;;  %p1436_p8 = scmp.ne.s32.totalorder %s982_s24, %s1435_s25  ;;  %p1441_p10 = scmp.lt.s32.totalorder %s1435_s25, %s1435_s25 }
 0x317   :  { %p1442_p11 = por %p1441_p10, %p1440_p9 }
 0x319   :  { %1380 = vrot.lane.b32.xlu0 %v1379_v24, %s1466_s0  ;;  %1375 = vrot.lane.b32.xlu1 %v1379_v24, %s1465_s11  ;;  %p1443_p12 = pnand %p1442_p11, %p1436_p8 }
 0x31d   :  { %1390 = vrot.lane.b32.xlu0 %v1379_v24, %s1467_s12  ;;  %1385 = vrot.lane.b32.xlu1 %v1379_v24, %s1468_s13 }
 0x321   :  { %789 = vrot.lane.b32.xlu0 %v1927_v46, %s1469_s14  ;;  %798 = vrot.lane.b32.xlu1 %v1927_v46, %s1472_s16 }
 0x325   :  { %1405 = vrot.lane.b32.xlu0 %v1404_v29, %s1470_s15  ;;  %1395 = vrot.lane.b32.xlu1 %v1404_v29, %s1469_s14 }
 0x329   :  { %807 = vrot.lane.b32.xlu0 %v1927_v46, %s1470_s15  ;;  %1400 = vrot.lane.b32.xlu1 %v1404_v29, %s1472_s16 }
 0x32d   :  { %820 = vrot.lane.b32.xlu0 %v1918_v38, %s1475_s17  ;;  %818 = vrot.lane.b32.xlu1 %v1930_v47, %s1475_s17 }
 0x331   :  { %374 = vperm.xlu0 %1409, %v41_v39   ;;  %816 = vrot.lane.b32.xlu1 %v1927_v46, %s1475_s17 }
 0x383   :  { %v767_v42 = vpop.permute.xlu0 %766  ;;  %v758_v51 = vpop.permute.xlu1 %757 }
 0x387   :  { %v785_v55 = vpop.permute.xlu0 %784  ;;  %v776_v57 = vpop.permute.xlu1 %775 }
 0x38b   :  { %v1381_v59 = vpop.permute.xlu0 %1380  ;;  %v1376_v60 = vpop.permute.xlu1 %1375 }
 0x38c   :  { %v1383_v61 = vunpack.i.h.bf16 %v1381_v59  ;;  %v1382_v63 = vunpack.i.l.bf16 %v1381_v59  ;;  %v1378_v62 = vunpack.i.h.bf16 %v1376_v60  ;;  %v1377_v1 = vunpack.i.l.bf16 %v1376_v60 }
 0x38e   :  { %v768_v3 = vsel %vm64_vm2, %v1383_v61, %v767_v42  ;;  %v770_v4 = vsel %vm64_vm2, %v767_v42, %v1382_v63  ;;  %v759_v2 = vsel %vm54_vm1, %v1378_v62, %v758_v51  ;;  %v761_v9 = vsel %vm54_vm1, %v758_v51, %v1377_v1 }
 0x38f   :  { %v1226_v56 = vpack.c.bf16 %v768_v3, %v759_v2  ;;  %v1211_v5 = vpack.c.bf16 %v770_v4, %v761_v9  ;;  %v1391_v7 = vpop.permute.xlu0 %1390  ;;  %v1386_v8 = vpop.permute.xlu1 %1385  ;;  %v760_v44 = vsel %vm54_vm1, %v1377_v1, %v1378_v62  ;;  %v769_v10 = vsel %vm64_vm2, %v1382_v63, %v1383_v61 }
 0x390   :  { %v1393_v12 = vunpack.i.h.bf16 %v1391_v7  ;;  %v1392_v13 = vunpack.i.l.bf16 %v1391_v7  ;;  %v1388_v14 = vunpack.i.h.bf16 %v1386_v8  ;;  %v1387_v15 = vunpack.i.l.bf16 %v1386_v8  ;;  %v1411_v8 = vld [vmem:[#allocation2 + $0x8] sm:$0xff] }
 0x391   :  { %v1209_v17 = vpack.c.bf16 %v769_v10, %v760_v44  ;;  %1227 = vmatpush3.bf16.msra.mxu1 %v1226_v56  ;;  %v1412_v44 = vld [vmem:[#allocation2 + $0x10] sm:$0xff] }
 0x392   :  { %v786_v18 = vsel %vm84_vm3, %v1393_v12, %v785_v55  ;;  %v788_v21 = vsel %vm84_vm3, %v785_v55, %v1392_v13  ;;  %v777_v58 = vsel %vm74_vm4, %v1388_v14, %v776_v57  ;;  %v779_v22 = vsel %vm74_vm4, %v776_v57, %v1387_v15  ;;  %1228 = vmatprep.subr.bf16.mxu1 %v1464_v0 }
 0x393   :  { %v1229_v23 = vpack.c.bf16 %v786_v18, %v777_v58  ;;  %1210 = vmatprep.subr.bf16.mxu0 %v1209_v17  ;;  %v790_v48 = vpop.permute.xlu0 %789  ;;  %v799_v25 = vpop.permute.xlu1 %798  ;;  %v778_v54 = vsel %vm74_vm4, %v1387_v15, %v1388_v14  ;;  %v787_v26 = vsel %vm84_vm3, %v1392_v13, %v1393_v12  ;;  %v1215_v49 = vpack.c.bf16 %v788_v21, %v779_v22 }
 0x394   :  { %1212 = vmatpush1.bf16.msra.mxu0 %v1211_v5  ;;  %v1213_v27 = vpack.c.bf16 %v787_v26, %v778_v54  ;;  %v1410_v5 = vld [vmem:[#allocation2] sm:$0xff] }
 0x395   :  { %1230 = vmatpush3.bf16.msra.mxu1 %v1229_v23 }
 0x396   :  { %1214 = vmatprep.subr.bf16.mxu0 %v1213_v27  ;;  %1231 = vmatprep.subr.bf16.mxu1 %v1464_v0 }
 0x397   :  { %v1406_v28 = vpop.permute.xlu0 %1405  ;;  %v1396_v31 = vpop.permute.xlu1 %1395 }
 0x398   :  { %1216 = vmatpush1.bf16.msra.mxu0 %v1215_v49  ;;  %v1398_v50 = vunpack.i.h.bf16 %v1396_v31  ;;  %v1397_v52 = vunpack.i.l.bf16 %v1396_v31  ;;  %v1408_v35 = vunpack.i.h.bf16 %v1406_v28  ;;  %v1407_v36 = vunpack.i.l.bf16 %v1406_v28 }
 0x39a   :  { %v797_v37 = vsel %vm94_vm5, %v1398_v50, %v790_v48  ;;  %v796_v16 = vsel %vm94_vm5, %v790_v48, %v1397_v52  ;;  %v795_v40 = vsel %vm94_vm5, %v1397_v52, %v1398_v50  ;;  %v813_v57 = vsel %vm114_vm6, %v1407_v36, %v1408_v35 }
 0x39b   :  { %v1232_v41 = vpack.c.bf16 %v797_v37, %v1918_v38  ;;  %v1219_v53 = vpack.c.bf16 %v796_v16, %v1927_v46  ;;  %v808_v45 = vpop.permute.xlu0 %807  ;;  %v1401_v24 = vpop.permute.xlu1 %1400  ;;  %v1217_v29 = vpack.c.bf16 %v795_v40, %v1930_v47 }
 0x39c   :  { %v1403_v39 = vunpack.i.h.bf16 %v1401_v24  ;;  %v1402_v42 = vunpack.i.l.bf16 %v1401_v24  ;;  %v814_v51 = vsel %vm114_vm6, %v808_v45, %v1407_v36  ;;  %v815_v55 = vsel %vm114_vm6, %v1408_v35, %v808_v45 }
 0x39d   :  { %1218 = vmatprep.subr.bf16.mxu0 %v1217_v29  ;;  %1233 = vmatpush3.bf16.msra.mxu1 %v1232_v41 }
 0x39e   :  { %v806_v38 = vsel %vm104_vm7, %v1403_v39, %v799_v25  ;;  %v805_v46 = vsel %vm104_vm7, %v799_v25, %v1402_v42  ;;  %1220 = vmatpush1.bf16.msra.mxu0 %v1219_v53  ;;  %1234 = vmatprep.subr.bf16.mxu1 %v1464_v0  ;;  %v804_v47 = vsel %vm104_vm7, %v1402_v42, %v1403_v39 }
 0x39f   :  { %v1235_v59 = vpack.c.bf16 %v815_v55, %v806_v38  ;;  %v1223_v60 = vpack.c.bf16 %v814_v51, %v805_v46  ;;  %v821_v61 = vpop.permute.xlu0 %820  ;;  %v819_v63 = vpop.permute.xlu1 %818  ;;  %v1221_v62 = vpack.c.bf16 %v813_v57, %v804_v47 }
 0x3a0   :  { %v822_v1 = vsel %vm124_vm8, %v819_v63, %v821_v61 }
 0x3a1   :  { %1222 = vmatprep.subr.bf16.mxu0 %v1221_v62  ;;  %1236 = vmatpush3.bf16.msra.mxu1 %v1235_v59 }
 0x3a2   :  { %1224 = vmatpush1.bf16.msra.mxu0 %v1223_v60  ;;  %1120 = vmatprep.subr.mxu1 %v1471_v6 }
 0x3a3   :  { %v817_v3 = vpop.permute.xlu1 %816  ;;  %841 = vmatprep.subr.mxu0 %v822_v1 }
 0x3a4   :  { %v823_v0 = vsel %vm124_vm8, %v817_v3, %v819_v63  ;;  %v824_v4 = vsel %vm124_vm8, %v821_v61, %v817_v3 }
 0x3a5   :  { %1121 = vmatpush3.msra.mxu1 %v824_v4 }
 0x3a6   :  { %842 = vmatpush1.msra.mxu0 %v823_v0  ;;  %1123 = vmatmul.mubr.msk.f32.vlgmr.msra.gmra.mrb[6].mxu1 %vm133_vm9, %v1824_v43 }
 0x3a7   :  { %999 = vmatmul.mubr.msk.f32.vlgmr.msra.gmra.mrb[6].mxu0 %vm133_vm9, %v1824_v43 }
 0x3b0   :  { %v375_v2 = vpop.permute.xlu0 %374 }
 0x3b1   :  { %v447_v9 = vadd.f32 %v1912_v32, %v375_v2  ;;  %v449_v6 = vadd.f32 %v1914_v34, %v375_v2  ;;  %v518_v56 = vadd.f32 %v1910_v30, %v375_v2 }
 0x3b3   :  { %v521_v7 = vadd.f32 %v1410_v5, %v447_v9  ;;  %v522_v11 = vadd.f32 %v1411_v8, %v449_v6  ;;  %v523_v10 = vadd.f32 %v1412_v44, %v518_v56 }
 0x3b5   :  { %v524_v12 = vmax.f32 %v521_v7, 0.0  ;;  %v525_v13 = vmax.f32 %v522_v11, 0.0  ;;  %v526_v14 = vmax.f32 %v523_v10, 0.0 }
 0x3b7   :  { %527 = vst [vmem:[#allocation5] sm:$0xff] %v524_v12  ;;  %528 = vst [vmem:[#allocation5 + $0x8] sm:$0xff] %v525_v13 }
 0x3b8   :  { %529 = vst [vmem:[#allocation5 + $0x10] sm:$0xff] %v526_v14 }
 0x479   :  { %v962_v43 = vpop.f32.mrb[6].mxu1 }
 0x47a   :  { %v891_v15 = vpop.f32.mrb[6].mxu0  ;;  %v963_v17 = vadd.f32 %v962_v43, %v375_v2  ;;  %v1124_v32 = vpop.f32.mrb[7].mxu1 }
 0x47b   :  { %v892_v18 = vadd.f32 %v891_v15, %v375_v2  ;;  %v893_v34 = vpop.f32.mrb[7].mxu0 }
 0x47c   :  { %v968_v30 = vadd.f32 %v963_v17, %v1652_v20  ;;  %v894_v21 = vadd.f32 %v893_v34, %v375_v2 }
 0x47d   :  { %v966_v58 = vadd.f32 %v892_v18, %v1666_v33 }
 0x47e   :  { %v971_v22 = vmax.f32 %v968_v30, 0.0  ;;  %v967_v23 = vadd.f32 %v894_v21, %v1650_v19 }
 0x47f   :  { %v969_v48 = vmax.f32 %v966_v58, 0.0 }
 0x480   :  { %975 = vst [vmem:[#allocation5 + $0x28] sm:$0xff] %v971_v22  ;;  %v970_v25 = vmax.f32 %v967_v23, 0.0 }
 0x481   :  { %973 = vst [vmem:[#allocation5 + $0x18] sm:$0xff] %v969_v48 }
 0x482   :  { %974 = vst [vmem:[#allocation5 + $0x20] sm:$0xff] %v970_v25 }
 0x483   :  { %1446 = shalt.err (!%p1443_p12)
}
 0x484   :  { %s1447_s28 = scalar_lea.hbm %s2048_s6, 768 }
 0x485   :  { %p1448_p13 = scmp.ne.s32.totalorder %s2048_s6, %s1447_s28  ;;  %p1451_p0 = scmp.lt.u32.totalorder %s1447_s28, %s2048_s6 }
 0x487   :  { %p1453_p1 = pnand %p1451_p0, %p1448_p13 }
 0x489   :  { %1456 = shalt.err (!%p1453_p1)
}
 0x48a   :  { %987 = dma.vmem_to_hbm [thread:$0]  %s982_s24, 768, %s2048_s6, [#allocation4], %s1462_s7, %s1462_s7, %s1463_s8  }
 0x48b   :  { %1459 = dma.done.wait [#allocation4], 768  }
 0x48c   :  { %1460 = vsyncadd [#allocation4], 4294966528 }
 0x48d   :  { %991 = vsyncpa [#allocation3], 1 }
 0x48e   :  { %992 = vsyncpa [#allocation4], 1 }

</bundles_post_ra>
